<compile_context>
chip_gen: v7x
topology: tpu7x:2x2x1
jax: 0.10.0
libtpu: 0.0.40
codegen_flags: <defaults>
</compile_context>

<pallas_src>
import functools

import jax
import jax.numpy as jnp
from jax.experimental import pallas as pl
from jax.experimental.pallas import tpu as pltpu


def _lwconv_layer_kernel(
    x_ref,     # (BB, T, d_model)  f32 input block (BB batch rows)
    m_ref,     # (BB, T, 1)        f32 conv mask (0/1)
    w1v_ref,   # (d_model, C)      bf16, value half of linear_1 (pre-transposed)
    w1g_ref,   # (d_model, C)      bf16, gate half of linear_1
    b1v_ref,   # (1, C)            f32
    b1g_ref,   # (1, C)            f32
    cw_ref,    # (K, C)            f32 per-channel conv weights (softmax pre-applied)
    w2_ref,    # (C, d_model)      bf16, linear_2 weight (pre-transposed)
    b2_ref,    # (1, d_model)      f32
    o_ref,     # (BB, T, d_model)  f32
    *,
    conv_dim: int,
    kernel_size: int,
    padding_l: int,
):
    BB, T, D = x_ref.shape
    C = conv_dim
    K = kernel_size
    N = BB * T  # batch rows folded into the matmul M dimension

    # ---- linear_1 (split into value/gate) + GLU, bf16 MXU / f32 accumulate ----
    x = x_ref[...].reshape(N, D)
    xb = x.astype(jnp.bfloat16)
    a = jnp.dot(xb, w1v_ref[...], preferred_element_type=jnp.float32) + b1v_ref[...]
    g = jnp.dot(xb, w1g_ref[...], preferred_element_type=jnp.float32) + b1g_ref[...]
    z = a * jax.nn.sigmoid(g)                       # (N, C) f32, VPU/EUP

    # masked_fill(conv_mask == 0, 0)  ->  multiply by the 0/1 mask (single vmul)
    z = z * m_ref[...].reshape(N, 1)

    cw = cw_ref[...]                                # (K, C)

    # time index within each batch row (for zero-padding masks at sequence edges
    # and to keep the rolls from leaking across batch boundaries)
    t_idx = jax.lax.broadcasted_iota(jnp.int32, (BB, T, C), 1).reshape(N, C)

    # depthwise conv along time via XLU rolls:
    #   out[t, c] = sum_k cw[k, c] * z[t + k - padding_l, c]   (zero padded)
    acc = jnp.zeros((N, C), jnp.float32)
    for k in range(K):                              # K small & static -> unrolled
        s = padding_l - k                           # signed shift
        wk = cw[k:k + 1, :]                         # (1, C)
        if s == 0:
            acc = acc + wk * z
        else:
            zs = pltpu.roll(z, shift=s % N, axis=0)
            if s > 0:
                valid = t_idx >= s                  # rows reading "before" t=0
            else:
                valid = t_idx < (T + s)             # rows reading "past" t=T-1
            acc = acc + wk * jnp.where(valid, zs, jnp.float32(0.0))

    # ---- linear_2, bf16 MXU / f32 accumulate ----
    out = jnp.dot(acc.astype(jnp.bfloat16), w2_ref[...],
                  preferred_element_type=jnp.float32) + b2_ref[...]
    o_ref[...] = out.reshape(BB, T, D).astype(o_ref.dtype)


def lightweight_conv_layer(x, mask, params, *, conv_dim, kernel_size, num_heads,
                           weight_softmax=True, batch_group=None):
    """x: (B, T, d_model) f32; mask: (B, S, T) (0/1). Returns (B, T, d_model)."""
    w1, b1, conv_w, w2, b2 = params
    B, T, d_model = x.shape
    C = conv_dim
    K = kernel_size
    assert K % 2 == 1, "this script uses odd kernel_size (int padding_l)"
    padding_l = K // 2
    R = conv_dim // num_heads

    # How many batch rows to fold into the matmul M dim per grid step.
    if batch_group is None:
        batch_group = 1
        for cand in range(1, B + 1):
            if B % cand == 0:
                batch_group = cand
                if cand * T >= 128:
                    break
    BB = batch_group
    assert B % BB == 0

    # ---- parameter prep (done once, outside the hot path) ----
    w1f = jnp.asarray(w1, jnp.float32)                       # (2C, d_model) torch layout
    w1v = w1f[:C, :].T.astype(jnp.bfloat16)                  # (d_model, C) value half
    w1g = w1f[C:, :].T.astype(jnp.bfloat16)                  # (d_model, C) gate half
    b1f = jnp.asarray(b1, jnp.float32)
    b1v = b1f[:C][None, :]                                   # (1, C)
    b1g = b1f[C:][None, :]                                   # (1, C)
    w2t = jnp.asarray(w2, jnp.float32).T.astype(jnp.bfloat16)  # (C, d_model)
    b2r = jnp.asarray(b2, jnp.float32)[None, :]              # (1, d_model)

    # lightweight-conv head weights; softmax normalization hoisted out of kernel
    hw = jnp.asarray(conv_w, jnp.float32).reshape(num_heads, K)
    if weight_softmax:
        hw = jax.nn.softmax(hw, axis=-1)
    cw = jnp.repeat(hw, R, axis=0).T                         # (K, C); channel c -> head c//R

    # conv_mask = mask[:, -1, :].unsqueeze(-1)
    conv_mask = mask[:, -1, :][..., None].astype(jnp.float32)  # (B, T, 1)

    kernel = functools.partial(
        _lwconv_layer_kernel,
        conv_dim=C, kernel_size=K, padding_l=padding_l)

    flops = (2 * B * T * d_model * 2 * C          # linear_1 (both halves)
             + 2 * B * T * C * d_model            # linear_2
             + 2 * B * T * C * K)                 # depthwise conv
    transcendentals = B * T * C                   # sigmoid
    bytes_accessed = ((x.size + B * T * d_model + B * T) * 4
                      + (w1v.size + w1g.size + w2t.size) * 2
                      + (b1v.size + b1g.size + b2r.size + cw.size) * 4)

    return pl.pallas_call(
        kernel,
        out_shape=jax.ShapeDtypeStruct((B, T, d_model), jnp.float32),
        grid=(B // BB,),
        in_specs=[
            pl.BlockSpec((BB, T, d_model), lambda b: (b, 0, 0)),
            pl.BlockSpec((BB, T, 1), lambda b: (b, 0, 0)),
            pl.BlockSpec((d_model, C), lambda b: (0, 0)),
            pl.BlockSpec((d_model, C), lambda b: (0, 0)),
            pl.BlockSpec((1, C), lambda b: (0, 0)),
            pl.BlockSpec((1, C), lambda b: (0, 0)),
            pl.BlockSpec((K, C), lambda b: (0, 0)),
            pl.BlockSpec((C, d_model), lambda b: (0, 0)),
            pl.BlockSpec((1, d_model), lambda b: (0, 0)),
        ],
        out_specs=pl.BlockSpec((BB, T, d_model), lambda b: (b, 0, 0)),
        compiler_params=pltpu.CompilerParams(
            dimension_semantics=("parallel",),
            vmem_limit_bytes=48 * 1024 * 1024),
        cost_estimate=pl.CostEstimate(
            flops=flops,
            transcendentals=transcendentals,
            bytes_accessed=bytes_accessed),
    )(x.astype(jnp.float32), conv_mask, w1v, w1g, b1v, b1g, cw, w2t, b2r)


def _reference(x, mask, params, *, conv_dim, kernel_size, num_heads,
               weight_softmax=True):
    """Plain-JAX f32 reference mirroring the PyTorch forward (eval mode)."""
    w1, b1, conv_w, w2, b2 = params
    B, T, _ = x.shape
    K = kernel_size
    pad = K // 2
    R = conv_dim // num_heads

    h = x @ w1.T + b1
    a, g = h[..., :conv_dim], h[..., conv_dim:]
    z = a * jax.nn.sigmoid(g)
    cm = mask[:, -1, :][..., None]
    z = jnp.where(cm == 0, 0.0, z)

    w = conv_w.reshape(num_heads, K)
    if weight_softmax:
        w = jax.nn.softmax(w, axis=-1)
    wc = jnp.repeat(w, R, axis=0)  # (C, K)

    zp = jnp.pad(z, ((0, 0), (pad, K - 1 - pad), (0, 0)))
    out = jnp.zeros_like(z)
    for k in range(K):
        out = out + wc[:, k][None, None, :] * zp[:, k:k + T, :]
    return out @ w2.T + b2


if __name__ == "__main__":
    B, T = 2, 16
    d_model, conv_dim = 32, 32
    kernel_size, num_heads = 3, 4
    weight_softmax = True

    key = jax.random.PRNGKey(0)
    kx, km, k1, k2, k3, k4, k5 = jax.random.split(key, 7)

    x = jax.random.normal(kx, (B, T, d_model), jnp.float32)
    # attention-style mask (B, S, T); forward only uses its last row
    mask = (jax.random.uniform(km, (B, T, T)) > 0.3).astype(jnp.float32)

    # deterministic synthetic parameters (PyTorch nn.Linear / conv weight shapes)
    w1 = 0.1 * jax.random.normal(k1, (2 * conv_dim, d_model), jnp.float32)
    b1 = 0.1 * jax.random.normal(k2, (2 * conv_dim,), jnp.float32)
    conv_w = jax.random.normal(k3, (num_heads, 1, kernel_size), jnp.float32)
    w2 = 0.1 * jax.random.normal(k4, (d_model, conv_dim), jnp.float32)
    b2 = 0.1 * jax.random.normal(k5, (d_model,), jnp.float32)
    params = (w1, b1, conv_w, w2, b2)

    out = lightweight_conv_layer(
        x, mask, params,
        conv_dim=conv_dim, kernel_size=kernel_size,
        num_heads=num_heads, weight_softmax=weight_softmax)
    out = jax.block_until_ready(out)

    ref = _reference(
        x, mask, params,
        conv_dim=conv_dim, kernel_size=kernel_size,
        num_heads=num_heads, weight_softmax=weight_softmax)

    assert out.shape == (B, T, d_model)
    # tolerance relaxed vs the pure-f32 version because the matmuls now take
    # bf16 operands (f32 accumulation)
    assert jnp.allclose(out, ref, atol=2e-2, rtol=2e-2), "mismatch vs reference"
    print("KERNEL_OK")
</pallas_src>

<mosaic_0001>
module attributes {stable_mosaic.version = 11 : i64} {
  func.func @_lwconv_layer_kernel(%arg0: i32, %arg1: memref<2x16x32xf32, #tpu.memory_space<vmem>>, %arg2: memref<2x16x1xf32, #tpu.memory_space<vmem>>, %arg3: memref<32x32xbf16, #tpu.memory_space<vmem>>, %arg4: memref<32x32xbf16, #tpu.memory_space<vmem>>, %arg5: memref<1x32xf32, #tpu.memory_space<vmem>>, %arg6: memref<1x32xf32, #tpu.memory_space<vmem>>, %arg7: memref<3x32xf32, #tpu.memory_space<vmem>>, %arg8: memref<32x32xbf16, #tpu.memory_space<vmem>>, %arg9: memref<1x32xf32, #tpu.memory_space<vmem>>, %arg10: memref<2x16x32xf32, #tpu.memory_space<vmem>>) attributes {dimension_semantics = [#tpu.dimension_semantics<parallel>], iteration_bounds = array<i64: 1>, scalar_prefetch = 0 : i64, scratch_operands = 0 : i64, tpu.core_type = #tpu.core_type<tc>, window_params = [{transform_indices = @transform_0, window_bounds = array<i64: 2, 16, 32>}, {transform_indices = @transform_1, window_bounds = array<i64: 2, 16, 1>}, {pipeline_mode = #tpu.pipeline_mode<synchronous>, transform_indices = @transform_2, window_bounds = array<i64: 32, 32>}, {pipeline_mode = #tpu.pipeline_mode<synchronous>, transform_indices = @transform_3, window_bounds = array<i64: 32, 32>}, {pipeline_mode = #tpu.pipeline_mode<synchronous>, transform_indices = @transform_4, window_bounds = array<i64: 1, 32>}, {pipeline_mode = #tpu.pipeline_mode<synchronous>, transform_indices = @transform_5, window_bounds = array<i64: 1, 32>}, {pipeline_mode = #tpu.pipeline_mode<synchronous>, transform_indices = @transform_6, window_bounds = array<i64: 3, 32>}, {pipeline_mode = #tpu.pipeline_mode<synchronous>, transform_indices = @transform_7, window_bounds = array<i64: 32, 32>}, {pipeline_mode = #tpu.pipeline_mode<synchronous>, transform_indices = @transform_8, window_bounds = array<i64: 1, 32>}, {transform_indices = @transform_9, window_bounds = array<i64: 2, 16, 32>}]} {
    %c0 = arith.constant 0 : index
    %c0_0 = arith.constant 0 : index
    %c0_1 = arith.constant 0 : index
    %0 = vector.load %arg1[%c0, %c0_0, %c0_1] : memref<2x16x32xf32, #tpu.memory_space<vmem>>, vector<2x16x32xf32>
    %1 = vector.shape_cast %0 : vector<2x16x32xf32> to vector<32x32xf32>
    %2 = arith.truncf %1 : vector<32x32xf32> to vector<32x32xbf16>
    %c0_2 = arith.constant 0 : index
    %c0_3 = arith.constant 0 : index
    %3 = vector.load %arg3[%c0_2, %c0_3] : memref<32x32xbf16, #tpu.memory_space<vmem>>, vector<32x32xbf16>
    %cst = arith.constant dense<0.000000e+00> : vector<32x32xf32>
    %4 = tpu.matmul %2, %3, %cst {dimension_numbers = #tpu.dot_dimension_numbers<[1], [0], [0], [1], [0, 0, 1, 1], [], []>} : vector<32x32xbf16>, vector<32x32xbf16>, vector<32x32xf32> -> vector<32x32xf32>
    %c0_4 = arith.constant 0 : index
    %c0_5 = arith.constant 0 : index
    %5 = vector.load %arg5[%c0_4, %c0_5] : memref<1x32xf32, #tpu.memory_space<vmem>>, vector<1x32xf32>
    %6 = vector.broadcast %5 : vector<1x32xf32> to vector<32x32xf32>
    %7 = arith.addf %4, %6 : vector<32x32xf32>
    %c0_6 = arith.constant 0 : index
    %c0_7 = arith.constant 0 : index
    %8 = vector.load %arg4[%c0_6, %c0_7] : memref<32x32xbf16, #tpu.memory_space<vmem>>, vector<32x32xbf16>
    %cst_8 = arith.constant dense<0.000000e+00> : vector<32x32xf32>
    %9 = tpu.matmul %2, %8, %cst_8 {dimension_numbers = #tpu.dot_dimension_numbers<[1], [0], [0], [1], [0, 0, 1, 1], [], []>} : vector<32x32xbf16>, vector<32x32xbf16>, vector<32x32xf32> -> vector<32x32xf32>
    %c0_9 = arith.constant 0 : index
    %c0_10 = arith.constant 0 : index
    %10 = vector.load %arg6[%c0_9, %c0_10] : memref<1x32xf32, #tpu.memory_space<vmem>>, vector<1x32xf32>
    %11 = vector.broadcast %10 : vector<1x32xf32> to vector<32x32xf32>
    %12 = arith.addf %9, %11 : vector<32x32xf32>
    %13 = arith.negf %12 : vector<32x32xf32>
    %14 = math.exp %13 : vector<32x32xf32>
    %cst_11 = arith.constant 1.000000e+00 : f32
    %15 = vector.broadcast %cst_11 : f32 to vector<32x32xf32>
    %16 = arith.addf %15, %14 : vector<32x32xf32>
    %17 = arith.divf %15, %16 : vector<32x32xf32>
    %18 = arith.mulf %7, %17 : vector<32x32xf32>
    %c0_12 = arith.constant 0 : index
    %c0_13 = arith.constant 0 : index
    %c0_14 = arith.constant 0 : index
    %19 = vector.load %arg2[%c0_12, %c0_13, %c0_14] : memref<2x16x1xf32, #tpu.memory_space<vmem>>, vector<2x16x1xf32>
    %20 = vector.shape_cast %19 : vector<2x16x1xf32> to vector<32x1xf32>
    %21 = vector.broadcast %20 : vector<32x1xf32> to vector<32x32xf32>
    %22 = arith.mulf %18, %21 : vector<32x32xf32>
    %c0_15 = arith.constant 0 : index
    %c0_16 = arith.constant 0 : index
    %23 = vector.load %arg7[%c0_15, %c0_16] : memref<3x32xf32, #tpu.memory_space<vmem>>, vector<3x32xf32>
    %24 = tpu.iota {dimensions = array<i32: 1>} : vector<2x16x32xi32>
    %25 = vector.shape_cast %24 : vector<2x16x32xi32> to vector<32x32xi32>
    %cst_17 = arith.constant 0.000000e+00 : f32
    %26 = vector.broadcast %cst_17 : f32 to vector<32x32xf32>
    %27 = vector.extract_strided_slice %23 {offsets = [0, 0], sizes = [1, 32], strides = [1, 1]} : vector<3x32xf32> to vector<1x32xf32>
    %c1_i32 = arith.constant 1 : i32
    %28 = tpu.dynamic_rotate %22 by %c1_i32 dim 0 : vector<32x32xf32>, i32 -> vector<32x32xf32>
    %c1_i32_18 = arith.constant 1 : i32
    %29 = vector.broadcast %c1_i32_18 : i32 to vector<32x32xi32>
    %30 = arith.cmpi sge, %25, %29 : vector<32x32xi32>
    %cst_19 = arith.constant 0.000000e+00 : f32
    %31 = vector.broadcast %cst_19 : f32 to vector<32x32xf32>
    %32 = arith.select %30, %28, %31 : vector<32x32xi1>, vector<32x32xf32>
    %33 = vector.broadcast %27 : vector<1x32xf32> to vector<32x32xf32>
    %34 = arith.mulf %33, %32 : vector<32x32xf32>
    %35 = arith.addf %26, %34 : vector<32x32xf32>
    %36 = vector.extract_strided_slice %23 {offsets = [1, 0], sizes = [1, 32], strides = [1, 1]} : vector<3x32xf32> to vector<1x32xf32>
    %37 = vector.broadcast %36 : vector<1x32xf32> to vector<32x32xf32>
    %38 = arith.mulf %37, %22 : vector<32x32xf32>
    %39 = arith.addf %35, %38 : vector<32x32xf32>
    %40 = vector.extract_strided_slice %23 {offsets = [2, 0], sizes = [1, 32], strides = [1, 1]} : vector<3x32xf32> to vector<1x32xf32>
    %c31_i32 = arith.constant 31 : i32
    %41 = tpu.dynamic_rotate %22 by %c31_i32 dim 0 : vector<32x32xf32>, i32 -> vector<32x32xf32>
    %c15_i32 = arith.constant 15 : i32
    %42 = vector.broadcast %c15_i32 : i32 to vector<32x32xi32>
    %43 = arith.cmpi slt, %25, %42 : vector<32x32xi32>
    %cst_20 = arith.constant 0.000000e+00 : f32
    %44 = vector.broadcast %cst_20 : f32 to vector<32x32xf32>
    %45 = arith.select %43, %41, %44 : vector<32x32xi1>, vector<32x32xf32>
    %46 = vector.broadcast %40 : vector<1x32xf32> to vector<32x32xf32>
    %47 = arith.mulf %46, %45 : vector<32x32xf32>
    %48 = arith.addf %39, %47 : vector<32x32xf32>
    %49 = arith.truncf %48 : vector<32x32xf32> to vector<32x32xbf16>
    %c0_21 = arith.constant 0 : index
    %c0_22 = arith.constant 0 : index
    %50 = vector.load %arg8[%c0_21, %c0_22] : memref<32x32xbf16, #tpu.memory_space<vmem>>, vector<32x32xbf16>
    %cst_23 = arith.constant dense<0.000000e+00> : vector<32x32xf32>
    %51 = tpu.matmul %49, %50, %cst_23 {dimension_numbers = #tpu.dot_dimension_numbers<[1], [0], [0], [1], [0, 0, 1, 1], [], []>} : vector<32x32xbf16>, vector<32x32xbf16>, vector<32x32xf32> -> vector<32x32xf32>
    %c0_24 = arith.constant 0 : index
    %c0_25 = arith.constant 0 : index
    %52 = vector.load %arg9[%c0_24, %c0_25] : memref<1x32xf32, #tpu.memory_space<vmem>>, vector<1x32xf32>
    %53 = vector.broadcast %52 : vector<1x32xf32> to vector<32x32xf32>
    %54 = arith.addf %51, %53 : vector<32x32xf32>
    %55 = vector.shape_cast %54 : vector<32x32xf32> to vector<2x16x32xf32>
    %c0_26 = arith.constant 0 : index
    %c0_27 = arith.constant 0 : index
    %c0_28 = arith.constant 0 : index
    %56 = vector.load %arg10[%c0_26, %c0_27, %c0_28] : memref<2x16x32xf32, #tpu.memory_space<vmem>>, vector<2x16x32xf32>
    tpu.vector_store %arg10[%c0_26, %c0_27, %c0_28], %55 {strides = array<i32>} : memref<2x16x32xf32, #tpu.memory_space<vmem>>, vector<2x16x32xf32>,
    return
  }
  func.func @transform_0(%arg0: i32) -> (i32, i32, i32) {
    %c0_i32 = arith.constant 0 : i32
    %c0_i32_0 = arith.constant 0 : i32
    %c0_i32_1 = arith.constant 0 : i32
    return %arg0, %c0_i32, %c0_i32_0 : i32, i32, i32
  }
  func.func @transform_1(%arg0: i32) -> (i32, i32, i32) {
    %c0_i32 = arith.constant 0 : i32
    %c0_i32_0 = arith.constant 0 : i32
    %c0_i32_1 = arith.constant 0 : i32
    return %arg0, %c0_i32, %c0_i32_0 : i32, i32, i32
  }
  func.func @transform_2(%arg0: i32) -> (i32, i32) {
    %c0_i32 = arith.constant 0 : i32
    %c0_i32_0 = arith.constant 0 : i32
    %c0_i32_1 = arith.constant 0 : i32
    return %c0_i32, %c0_i32_0 : i32, i32
  }
  func.func @transform_3(%arg0: i32) -> (i32, i32) {
    %c0_i32 = arith.constant 0 : i32
    %c0_i32_0 = arith.constant 0 : i32
    %c0_i32_1 = arith.constant 0 : i32
    return %c0_i32, %c0_i32_0 : i32, i32
  }
  func.func @transform_4(%arg0: i32) -> (i32, i32) {
    %c0_i32 = arith.constant 0 : i32
    %c0_i32_0 = arith.constant 0 : i32
    %c0_i32_1 = arith.constant 0 : i32
    return %c0_i32, %c0_i32_0 : i32, i32
  }
  func.func @transform_5(%arg0: i32) -> (i32, i32) {
    %c0_i32 = arith.constant 0 : i32
    %c0_i32_0 = arith.constant 0 : i32
    %c0_i32_1 = arith.constant 0 : i32
    return %c0_i32, %c0_i32_0 : i32, i32
  }
  func.func @transform_6(%arg0: i32) -> (i32, i32) {
    %c0_i32 = arith.constant 0 : i32
    %c0_i32_0 = arith.constant 0 : i32
    %c0_i32_1 = arith.constant 0 : i32
    return %c0_i32, %c0_i32_0 : i32, i32
  }
  func.func @transform_7(%arg0: i32) -> (i32, i32) {
    %c0_i32 = arith.constant 0 : i32
    %c0_i32_0 = arith.constant 0 : i32
    %c0_i32_1 = arith.constant 0 : i32
    return %c0_i32, %c0_i32_0 : i32, i32
  }
  func.func @transform_8(%arg0: i32) -> (i32, i32) {
    %c0_i32 = arith.constant 0 : i32
    %c0_i32_0 = arith.constant 0 : i32
    %c0_i32_1 = arith.constant 0 : i32
    return %c0_i32, %c0_i32_0 : i32, i32
  }
  func.func @transform_9(%arg0: i32) -> (i32, i32, i32) {
    %c0_i32 = arith.constant 0 : i32
    %c0_i32_0 = arith.constant 0 : i32
    %c0_i32_1 = arith.constant 0 : i32
    return %arg0, %c0_i32, %c0_i32_0 : i32, i32, i32
  }
}

</mosaic_0001>

<bundles_post_ra>
// kernel: tpu_custom_call.1
= control target key start
LH: loop header
LB: loop body
LE: loop exit
PB: predicated region body
PF: predicated region fallthrough
CT: control target
= control target key end

     0   :  { %14 = vsyncpa [#allocation3], 0  ;;  %s882_s0 = inlined_call_operand.vmem [shape: f32[2,16,32], index: 0, kind: input, shape index: {}]   ;;  %s883_s1 = inlined_call_operand.vmem [shape: f32[2,16,1], index: 1, kind: input, shape index: {}]   ;;  %s884_s2 = inlined_call_operand.hbm [shape: bf16[32,32], index: 2, kind: input, shape index: {}]   ;;  %s885_s3 = inlined_call_operand.hbm [shape: bf16[32,32], index: 3, kind: input, shape index: {}]   ;;  %s886_s4 = inlined_call_operand.hbm [shape: f32[1,32], index: 4, kind: input, shape index: {}]   ;;  %s887_s5 = inlined_call_operand.hbm [shape: f32[1,32], index: 5, kind: input, shape index: {}]   ;;  %s888_s6 = inlined_call_operand.vmem [shape: f32[3,32], index: 6, kind: input, shape index: {}]   ;;  %s889_s7 = inlined_call_operand.vmem [shape: bf16[32,32], index: 7, kind: input, shape index: {}]   ;;  %s890_s8 = inlined_call_operand.vmem [shape: f32[1,32], index: 8, kind: input, shape index: {}]   ;;  %s891_s9 = inlined_call_operand.hbm [shape: f32[2,16,32], index: 9, kind: output, shape index: {}]  }
   0x1   :  { %15 = vsyncpa [#allocation6], 0 }
   0x2   :  { %16 = vsyncpa [#allocation9], 0 }
   0x3   :  { %17 = vsyncpa [#allocation4], 0  ;;  %s678_s30 = smov [#allocation5]   ;;  %s679_s11 = smov [#allocation2]  }
   0x4   :  { %s39_s10 = sshll.u32 %s678_s30, 4  ;;  %s27_s12 = sshll.u32 %s679_s11, 4  ;;  %s40_s10 = int_to_ptr.vmem [resolvable:$true] %s39_s10  ;;  %s738_s12 = int_to_ptr.vmem [resolvable:$true] %s27_s12 }
   0x5   :  { %s560_s15 = scalar_lea.hbm %s885_s3, 256 }
   0x6   :  { %p561_p0 = scmp.ne.s32.totalorder %s885_s3, %s560_s15  ;;  %p564_p1 = scmp.lt.u32.totalorder %s560_s15, %s885_s3 }
   0x8   :  { %p566_p2 = pnand %p564_p1, %p561_p0 }
   0xa   :  { %569 = shalt.err (!%p566_p2)
}
   0xb   :  { %s570_s20 = scalar_lea.vmem %s40_s10, 256  ;;  %p575_p4 = scmp.lt.s32.totalorder %s40_s10, %s40_s10 }
   0xc   :  { %p571_p3 = scmp.ne.s32.totalorder %s40_s10, %s570_s20  ;;  %p576_p5 = scmp.lt.s32.totalorder %s570_s20, %s570_s20 }
   0xe   :  { %p577_p6 = por %p576_p5, %p575_p4 }
  0x10   :  { %p578_p7 = pnand %p577_p6, %p571_p3 }
  0x12   :  { %581 = shalt.err (!%p578_p7)
}
  0x13   :  { %s680_s21 = smov 64   ;;  %s681_s22 = smov 4  }
  0x14   :  { %45 = dma.hbm_to_vmem [thread:$0]  %s885_s3, 256, %s40_s10, [#allocation6], %s680_s21, %s680_s21, %s681_s22  }
  0x15   :  { %s582_s27 = scalar_lea.hbm %s884_s2, 256 }
  0x16   :  { %p583_p8 = scmp.ne.s32.totalorder %s884_s2, %s582_s27  ;;  %p586_p9 = scmp.lt.u32.totalorder %s582_s27, %s884_s2 }
  0x18   :  { %p588_p10 = pnand %p586_p9, %p583_p8 }
  0x1a   :  { %591 = shalt.err (!%p588_p10)
}
  0x1b   :  { %s592_s13 = scalar_lea.vmem %s738_s12, 256  ;;  %p597_p12 = scmp.lt.s32.totalorder %s738_s12, %s738_s12 }
  0x1c   :  { %p593_p11 = scmp.ne.s32.totalorder %s738_s12, %s592_s13  ;;  %p598_p13 = scmp.lt.s32.totalorder %s592_s13, %s592_s13 }
  0x1e   :  { %p599_p0 = por %p598_p13, %p597_p12 }
  0x20   :  { %p600_p1 = pnand %p599_p0, %p593_p11 }
  0x22   :  { %603 = shalt.err (!%p600_p1)
}
  0x23   :  { %33 = dma.hbm_to_vmem [thread:$0]  %s884_s2, 256, %s738_s12, [#allocation3], %s680_s21, %s680_s21, %s681_s22  }
  0x24   :  { %s682_s14 = smov [#allocation7]   ;;  %s683_s16 = smov [#allocation8]  }
  0x25   :  { %s52_s15 = sshll.u32 %s682_s14, 4  ;;  %s62_s17 = sshll.u32 %s683_s16, 4  ;;  %s53_s15 = int_to_ptr.vmem [resolvable:$true] %s52_s15  ;;  %s63_s17 = int_to_ptr.vmem [resolvable:$true] %s62_s17 }
  0x26   :  { %s604_s20 = scalar_lea.hbm %s886_s4, 16 }
  0x27   :  { %p605_p2 = scmp.ne.s32.totalorder %s886_s4, %s604_s20  ;;  %p608_p3 = scmp.lt.u32.totalorder %s604_s20, %s886_s4 }
  0x29   :  { %p610_p4 = pnand %p608_p3, %p605_p2 }
  0x2b   :  { %613 = shalt.err (!%p610_p4)
}
  0x2c   :  { %s614_s2 = scalar_lea.vmem %s53_s15, 16  ;;  %s618_s12 = scalar_lea.vmem %s53_s15, 32 }
  0x2d   :  { %p615_p5 = scmp.ne.s32.totalorder %s53_s15, %s614_s2  ;;  %p619_p6 = scmp.lt.s32.totalorder %s53_s15, %s53_s15 }
  0x2e   :  { %p620_p7 = scmp.lt.s32.totalorder %s618_s12, %s614_s2 }
  0x30   :  { %p621_p8 = por %p620_p7, %p619_p6 }
  0x32   :  { %p622_p9 = pnand %p621_p8, %p615_p5 }
  0x34   :  { %625 = shalt.err (!%p622_p9)
}
  0x35   :  { %55 = dma.hbm_to_vmem [thread:$0]  %s886_s4, 16, %s53_s15, [#allocation6]  }
  0x36   :  { %s626_s29 = scalar_lea.hbm %s887_s5, 16 }
  0x37   :  { %p627_p10 = scmp.ne.s32.totalorder %s887_s5, %s626_s29  ;;  %p630_p11 = scmp.lt.u32.totalorder %s626_s29, %s887_s5 }
  0x39   :  { %p632_p12 = pnand %p630_p11, %p627_p10 }
  0x3b   :  { %635 = shalt.err (!%p632_p12)
}
  0x3c   :  { %s636_s10 = scalar_lea.vmem %s63_s17, 16  ;;  %s640_s14 = scalar_lea.vmem %s63_s17, 32 }
  0x3d   :  { %p637_p13 = scmp.ne.s32.totalorder %s63_s17, %s636_s10  ;;  %p641_p0 = scmp.lt.s32.totalorder %s63_s17, %s63_s17 }
  0x3e   :  { %p642_p1 = scmp.lt.s32.totalorder %s640_s14, %s636_s10 }
  0x40   :  { %p643_p2 = por %p642_p1, %p641_p0 }
  0x42   :  { %p644_p3 = pnand %p643_p2, %p637_p13 }
  0x44   :  { %647 = shalt.err (!%p644_p3)
}
  0x45   :  { %65 = dma.hbm_to_vmem [thread:$0]  %s887_s5, 16, %s63_s17, [#allocation9]  }
  0x46   :  { %670 = dma.done.wait [#allocation3], 256  }
  0x47   :  { %671 = vsyncadd [#allocation3], 4294967040 }
  0x48   :  { %672 = dma.done.wait [#allocation6], 272  }
  0x49   :  { %673 = vsyncadd [#allocation6], 4294967024 }
  0x4a   :  { %674 = dma.done.wait [#allocation9], 16  }
  0x4b   :  { %675 = vsyncadd [#allocation9], 4294967280  ;;  %v684_v0 = vmov 0   ;;  %v538_v1 = vld [vmem:[#allocation5] sm:$0xff]   ;;  %v539_v2 = vld [vmem:[#allocation5 + $0x8] sm:$0xff]   ;;  %vm114_vm0 = vcmask 261120   ;;  %v299_v41 = vlaneseq }
  0x4c   :  { %536 = vset.pattern.permute.xlu0 %v684_v0  ;;  %537 = vset.pattern.permute.xlu1 %v684_v0  ;;  %v85_v3 = vld [vmem:[%s882_s0] sm:$0xff]  ;;  %v86_v4 = vld [vmem:[%s882_s0 + $0x8] sm:$0xff]  ;;  %v87_v5 = vld [vmem:[%s882_s0 + $0x10] sm:$0xff]  ;;  %s685_s3 = smov [#allocation10]  }
  0x4d   :  { %510 = vmatprep.subr.bf16.mxu1 %v538_v1  ;;  %v89_v6 = vpack.c.bf16 %v86_v4, %v85_v3  ;;  %v88_v7 = vld [vmem:[%s882_s0 + $0x18] sm:$0xff]  ;;  %v540_v8 = vld [vmem:[#allocation2] sm:$0xff]   ;;  %v541_v9 = vld [vmem:[#allocation2 + $0x8] sm:$0xff]   ;;  %v827_v44 = vshrl.u32 %v299_v41, 7  ;;  %s457_s10 = sshll.u32 %s685_s3, 4  ;;  %s458_s10 = int_to_ptr.vmem [resolvable:$true] %s457_s10 }
  0x4e   :  { %511 = vmatpush3.bf16.msra.mxu1 %v538_v1  ;;  %v270_v10 = vld [vmem:[%s883_s1] sm:$0xff]  ;;  %v271_v11 = vld [vmem:[%s883_s1 + $0x8] sm:$0xff]  ;;  %v90_v12 = vpack.c.bf16 %v88_v7, %v87_v5  ;;  %502 = vmatprep.subr.bf16.mxu0 %v540_v8  ;;  %v273_v13 = vld [vmem:[%s883_s1 + $0x18] sm:$0xff]  ;;  %p653_p5 = scmp.lt.s32.totalorder %s458_s10, %s458_s10 }
  0x4f   :  { %512 = vmatprep.subr.bf16.mxu1 %v539_v2  ;;  %514 = vmatprep.mubr.msk.bf16.mxu1 %vm114_vm0, %v89_v6  ;;  %v272_v14 = vld [vmem:[%s883_s1 + $0x10] sm:$0xff]  ;;  %v542_v15 = vld [vmem:[%s889_s7] sm:$0xff]   ;;  %v543_v16 = vld [vmem:[%s889_s7 + $0x8] sm:$0xff]   ;;  %v331_v49 = vsub.s32 1, %v827_v44  ;;  %v319_v51 = vsub.s32 0, %v827_v44  ;;  %v358_v53 = vsub.s32 2, %v827_v44 }
  0x50   :  { %506 = vmatprep.mubr.msk.bf16.mxu0 %vm114_vm0, %v89_v6  ;;  %276 = vperm.xlu0 %536, %v270_v10   ;;  %v476_v17 = vld [vmem:[#allocation8] ss:$0 sm:$0xff]  ;;  %v471_v43 = vld [vmem:[#allocation7] ss:$0 sm:$0xff]  ;;  %v301_v57 = vadd.s32 8, %v827_v44  ;;  %vm306_vm1 = vcmp.lt.s32.totalorder %v827_v44, 1 }
  0x51   :  { %503 = vmatpush3.bf16.msra.mxu0 %v540_v8  ;;  %281 = vperm.xlu1 %537, %v271_v11   ;;  %v298_v50 = vld [vmem:[%s888_s6] sm:$0x7]  ;;  %vm345_vm2 = vcmp.lt.s32.totalorder %v827_v44, 7  ;;  %vm311_vm3 = vcmp.ge.s32.totalorder %v827_v44, 1 }
  0x52   :  { %513 = vmatpush3.bf16.msra.mxu1 %v539_v2  ;;  %504 = vmatprep.subr.bf16.mxu0 %v541_v9  ;;  %v332_v61 = vrot.slane %v298_v50, %v331_v49  ;;  %v320_v0 = vrot.slane %v298_v50, %v319_v51  ;;  %v359_v5 = vrot.slane %v298_v50, %v358_v53  ;;  %vm351_vm4 = vcmp.lt.s32.totalorder %v301_v57, 15 }
  0x54   :  { %291 = vperm.xlu0 %536, %v273_v13  }
  0x55   :  { %515 = vmatmul.mubr.msk.bf16.vlgmr.msra.gmra.mrb[0].mxu1 %vm114_vm0, %v90_v12  ;;  %505 = vmatpush3.bf16.msra.mxu0 %v541_v9 }
  0x56   :  { %286 = vperm.xlu1 %537, %v272_v14   ;;  %518 = vmatprep.subr.bf16.mxu0 %v542_v15 }
  0x58   :  { %507 = vmatmul.mubr.msk.bf16.vlgmr.msra.gmra.mrb[0].mxu0 %vm114_vm0, %v90_v12 }
  0x59   :  { %519 = vmatpush3.bf16.msra.mxu0 %v542_v15 }
  0x5a   :  { %520 = vmatprep.subr.bf16.mxu0 %v543_v16 }
  0x5d   :  { %521 = vmatpush3.bf16.msra.mxu0 %v543_v16 }
  0xcf   :  { %v277_v47 = vpop.permute.xlu0 %276 }
  0xd0   :  { %v282_v45 = vpop.permute.xlu1 %281 }
  0xd3   :  { %v292_v6 = vpop.permute.xlu0 %291 }
  0xd5   :  { %v287_v54 = vpop.permute.xlu1 %286 }
 0x128   :  { %v516_v18 = vpop.f32.mrb[0].mxu1 }
 0x129   :  { %v236_v19 = vadd.f32 %v516_v18, %v476_v17  ;;  %v227_v20 = vpop.f32.mrb[1].mxu1 }
 0x12a   :  { %v228_v21 = vadd.f32 %v476_v17, %v227_v20  ;;  %v517_v22 = vpop.f32.mrb[2].mxu1 }
 0x12b   :  { %v483_v23 = vmul.f32 -1.442695, %v236_v19  ;;  %v239_v24 = vadd.f32 %v517_v22, %v476_v17  ;;  %v230_v25 = vpop.f32.mrb[3].mxu1  ;;  %v508_v28 = vpop.f32.mrb[0].mxu0 }
 0x12c   :  { %v481_v26 = vmul.f32 -1.442695, %v228_v21  ;;  %v231_v27 = vadd.f32 %v476_v17, %v230_v25  ;;  %v155_v30 = vpop.f32.mrb[1].mxu0  ;;  %v164_v46 = vadd.f32 %v508_v28, %v471_v43 }
 0x12d   :  { %544 = vpow2.f32 %v483_v23  ;;  %v484_v29 = vmul.f32 -1.442695, %v239_v24  ;;  %v509_v32 = vpop.f32.mrb[2].mxu0  ;;  %v156_v48 = vadd.f32 %v471_v43, %v155_v30 }
 0x12e   :  { %546 = vpow2.f32 %v481_v26  ;;  %v482_v31 = vmul.f32 -1.442695, %v231_v27  ;;  %v158_v33 = vpop.f32.mrb[3].mxu0  ;;  %v167_v56 = vadd.f32 %v509_v32, %v471_v43 }
 0x12f   :  { %548 = vpow2.f32 %v484_v29  ;;  %v159_v62 = vadd.f32 %v471_v43, %v158_v33 }
 0x130   :  { %550 = vpow2.f32 %v482_v31 }
 0x137   :  { %v545_v34 = vpop.eup %544 }
 0x138   :  { %v547_v35 = vpop.eup %546  ;;  %v256_v36 = vadd.f32 1.0, %v545_v34 }
 0x139   :  { %v549_v37 = vpop.eup %548  ;;  %v254_v38 = vadd.f32 1.0, %v547_v35 }
 0x13a   :  { %v551_v39 = vpop.eup %550  ;;  %552 = vrcp.f32 %v256_v36  ;;  %v257_v40 = vadd.f32 1.0, %v549_v37 }
 0x13b   :  { %554 = vrcp.f32 %v254_v38  ;;  %v255_v42 = vadd.f32 1.0, %v551_v39 }
 0x13c   :  { %556 = vrcp.f32 %v257_v40 }
 0x13d   :  { %558 = vrcp.f32 %v255_v42 }
 0x144   :  { %v553_v52 = vpop.eup %552 }
 0x145   :  { %v555_v55 = vpop.eup %554  ;;  %v268_v58 = vmul.f32 %v553_v52, %v164_v46  ;;  %v485_v52 = vld [vmem:[%s890_s8] ss:$0 sm:$0xff]  ;;  %s648_s8 = scalar_lea.vmem %s458_s10, 512 }
 0x146   :  { %v557_v59 = vpop.eup %556  ;;  %v266_v60 = vmul.f32 %v555_v55, %v156_v48  ;;  %p649_p4 = scmp.ne.s32.totalorder %s458_s10, %s648_s8  ;;  %p654_p6 = scmp.lt.s32.totalorder %s648_s8, %s648_s8 }
 0x147   :  { %v559_v63 = vpop.eup %558  ;;  %v269_v1 = vmul.f32 %v557_v59, %v167_v56  ;;  %v296_v2 = vmul.f32 %v287_v54, %v268_v58 }
 0x148   :  { %v294_v3 = vmul.f32 %v277_v47, %v266_v60  ;;  %v267_v4 = vmul.f32 %v559_v63, %v159_v62  ;;  %p655_p7 = por %p654_p6, %p653_p5 }
 0x149   :  { %v297_v7 = vmul.f32 %v292_v6, %v269_v1  ;;  %v304_v8 = vrot.slane %v296_v2, 7  ;;  %v335_v12 = vmul.f32 %v332_v61, %v296_v2  ;;  %v343_v16 = vrot.slane %v296_v2, 1 }
 0x14a   :  { %v302_v9 = vrot.slane %v294_v3, 7  ;;  %v341_v10 = vrot.slane %v294_v3, 1  ;;  %v295_v11 = vmul.f32 %v282_v45, %v267_v4  ;;  %v333_v13 = vmul.f32 %v332_v61, %v294_v3  ;;  %p656_p8 = pnand %p655_p7, %p649_p4 }
 0x14b   :  { %v305_v14 = vrot.slane %v297_v7, 7  ;;  %v344_v15 = vrot.slane %v297_v7, 1  ;;  %v336_v20 = vmul.f32 %v332_v61, %v297_v7 }
 0x14c   :  { %v303_v17 = vrot.slane %v295_v11, 7  ;;  %v334_v18 = vmul.f32 %v332_v61, %v295_v11  ;;  %v342_v19 = vrot.slane %v295_v11, 1 }
 0x14d   :  { %v310_v21 = vsel %vm306_vm1, %v305_v14, %v302_v9  ;;  %v349_v22 = vsel %vm345_vm2, %v344_v15, %v341_v10  ;;  %v307_v23 = vsel %vm306_vm1, %v304_v8, %v305_v14  ;;  %v346_v24 = vsel %vm345_vm2, %v343_v16, %v344_v15 }
 0x14e   :  { %v309_v25 = vsel %vm306_vm1, %v302_v9, %v303_v17  ;;  %v313_v26 = vsel %vm311_vm3, %v310_v21, 0.0  ;;  %v355_v27 = vsel %vm351_vm4, %v349_v22, 0.0  ;;  %v308_v28 = vsel %vm306_vm1, %v303_v17, %v304_v8 }
 0x14f   :  { %v322_v29 = vmul.f32 %v320_v0, %v309_v25  ;;  %v321_v30 = vmul.f32 %v320_v0, %v313_v26  ;;  %v363_v31 = vmul.f32 %v359_v5, %v355_v27  ;;  %v315_v32 = vsel %vm311_vm3, %v308_v28, 0.0 }
 0x150   :  { %v323_v33 = vmul.f32 %v320_v0, %v315_v32  ;;  %v324_v34 = vmul.f32 %v320_v0, %v307_v23  ;;  %v347_v35 = vsel %vm345_vm2, %v342_v19, %v343_v16  ;;  %v362_v36 = vmul.f32 %v359_v5, %v346_v24 }
 0x151   :  { %v338_v37 = vadd.f32 %v334_v18, %v322_v29  ;;  %v353_v38 = vsel %vm351_vm4, %v347_v35, 0.0  ;;  %v337_v39 = vadd.f32 %v333_v13, %v321_v30  ;;  %v348_v40 = vsel %vm345_vm2, %v341_v10, %v342_v19 }
 0x152   :  { %v339_v41 = vadd.f32 %v335_v12, %v323_v33  ;;  %v340_v42 = vadd.f32 %v336_v20, %v324_v34  ;;  %v360_v43 = vmul.f32 %v359_v5, %v348_v40  ;;  %v361_v45 = vmul.f32 %v359_v5, %v353_v38 }
 0x154   :  { %v366_v46 = vadd.f32 %v362_v36, %v339_v41  ;;  %v367_v47 = vadd.f32 %v363_v31, %v340_v42  ;;  %v364_v48 = vadd.f32 %v360_v43, %v337_v39  ;;  %v365_v49 = vadd.f32 %v361_v45, %v338_v37 }
 0x156   :  { %v369_v50 = vpack.c.bf16 %v367_v47, %v366_v46  ;;  %v368_v51 = vpack.c.bf16 %v365_v49, %v364_v48 }
 0x158   :  { %522 = vmatprep.mubr.msk.bf16.mxu0 %vm114_vm0, %v368_v51 }
 0x159   :  { %523 = vmatmul.mubr.msk.bf16.vlgmr.msra.gmra.mrb[4].mxu0 %vm114_vm0, %v369_v50 }
 0x22c   :  { %v524_v44 = vpop.f32.mrb[4].mxu0 }
 0x22d   :  { %v442_v53 = vadd.f32 %v524_v44, %v485_v52  ;;  %v433_v54 = vpop.f32.mrb[5].mxu0 }
 0x22e   :  { %v434_v55 = vadd.f32 %v485_v52, %v433_v54  ;;  %v525_v56 = vpop.f32.mrb[6].mxu0 }
 0x22f   :  { %450 = vst.msk [vmem:[#allocation10 + $0x10] sm:$0xff] %vm114_vm0, %v442_v53  ;;  %v445_v57 = vadd.f32 %v525_v56, %v485_v52  ;;  %v436_v58 = vpop.f32.mrb[7].mxu0 }
 0x230   :  { %448 = vst.msk [vmem:[#allocation10] sm:$0xff] %vm114_vm0, %v434_v55  ;;  %v437_v59 = vadd.f32 %v485_v52, %v436_v58 }
 0x231   :  { %451 = vst.msk [vmem:[#allocation10 + $0x18] sm:$0xff] %vm114_vm0, %v445_v57 }
 0x232   :  { %449 = vst.msk [vmem:[#allocation10 + $0x8] sm:$0xff] %vm114_vm0, %v437_v59 }
 0x233   :  { %659 = shalt.err (!%p656_p8)
}
 0x234   :  { %s660_s15 = scalar_lea.hbm %s891_s9, 512 }
 0x235   :  { %p661_p9 = scmp.ne.s32.totalorder %s891_s9, %s660_s15  ;;  %p664_p10 = scmp.lt.u32.totalorder %s660_s15, %s891_s9 }
 0x237   :  { %p666_p11 = pnand %p664_p10, %p661_p9 }
 0x239   :  { %669 = shalt.err (!%p666_p11)
}
 0x23a   :  { %s686_s5 = smov 128   ;;  %s687_s17 = smov 8  }
 0x23b   :  { %463 = dma.vmem_to_hbm [thread:$0]  %s458_s10, 512, %s891_s9, [#allocation4], %s686_s5, %s686_s5, %s687_s17  }
 0x23c   :  { %676 = dma.done.wait [#allocation4], 512  }
 0x23d   :  { %677 = vsyncadd [#allocation4], 4294966784 }
 0x23e   :  { %467 = vsyncpa [#allocation3], 1 }
 0x23f   :  { %468 = vsyncpa [#allocation6], 1 }
 0x240   :  { %469 = vsyncpa [#allocation9], 1 }
 0x241   :  { %470 = vsyncpa [#allocation4], 1 }

</bundles_post_ra>
